<compile_context>
chip_gen: v5e
topology: v5e:2x2
jax: 0.10.0
libtpu: 0.0.40
codegen_flags: <defaults>
</compile_context>

<pallas_src>
import functools

import jax
import jax.numpy as jnp
from jax.experimental import pallas as pl
from jax.experimental.pallas import tpu as pltpu

EPS = 1e-5


# ----------------------------------------------------------------------------
# Pallas kernel: 3x3 conv (stride 1, pad 1) + folded-BN bias (+ optional ReLU)
# ----------------------------------------------------------------------------
def _conv3x3_bn_kernel(x_ref, w_ref, b_ref, m_ref, o_ref, *,
                       width, block_n, apply_relu, compute_dtype):
    """Channels-on-sublanes / spatial-on-lanes conv, one im2col matmul per image.

    x_ref: (block_n, Cin, M)   f32   M = H*W (cast to bf16 in-kernel)
    w_ref: (Cout, 9*Cin)       bf16  BN-scale-folded weights, tap-major K order
    b_ref: (Cout, 1)           f32   folded-BN bias
    m_ref: (2, M)              f32   row 0: w!=0 mask, row 1: w!=W-1 mask
    o_ref: (block_n, Cout, M)  f32
    """
    cin = x_ref.shape[1]
    mout = x_ref.shape[2]

    msk = m_ref[...]                       # (2, M)
    left_ok = msk[0:1, :]                  # zero out reads that wrapped past col 0
    right_ok = msk[1:2, :]                 # zero out reads that wrapped past col W-1
    w_mat = w_ref[...]                     # (Cout, 9*Cin) bf16
    bias = b_ref[...]                      # (Cout, 1)     f32
    zpad = jnp.zeros((cin, 128), x_ref.dtype)   # vertical halo (rows above/below)

    for b in range(block_n):               # small static unroll over images
        x_img = x_ref[b]                                    # (Cin, M) f32
        xe = jnp.concatenate([zpad, x_img, zpad], axis=1)   # (Cin, M + 256)
        taps = []
        for dy in range(3):                # 9 statically-shifted lane windows
            for dx in range(3):
                s = (dy - 1) * width + (dx - 1)
                t = xe[:, 128 + s:128 + s + mout]           # (Cin, M)
                if dx == 0:
                    t = t * left_ok
                elif dx == 2:
                    t = t * right_ok
                taps.append(t)
        # im2col RHS: one deep matmul (K = 9*Cin) instead of 9 shallow ones.
        rhs = jnp.concatenate(taps, axis=0).astype(compute_dtype)   # (9*Cin, M)
        acc = jnp.dot(w_mat, rhs, preferred_element_type=jnp.float32)  # (Cout, M)
        y = acc + bias                      # folded-BN bias, f32 epilogue
        if apply_relu:
            y = jnp.maximum(y, 0.0)
        o_ref[b] = y.astype(o_ref.dtype)    # single, lane-dense store per image


# ----------------------------------------------------------------------------
# Wrapper: only free reshapes + tiny constant weight/mask prep
# ----------------------------------------------------------------------------
def conv3x3_bn_nchw(x_nchw, w_hwio, scale, bias, *, relu=False,
                    compute_dtype=jnp.bfloat16, max_block_n=8):
    n, cin, h, w = x_nchw.shape
    cout = w_hwio.shape[-1]
    m = h * w
    assert w + 1 <= 128, "128-lane halo assumes image width <= 127"

    xflat = x_nchw.reshape(n, cin, m)       # contiguous -> free (no HBM pass)

    # Fold BN scale into the weights; K ordering = (dy, dx, ci), tap-major.
    w_mat = jnp.transpose(w_hwio * scale[None, None, None, :],
                          (3, 0, 1, 2)).reshape(cout, 9 * cin).astype(compute_dtype)
    bias2d = bias.reshape(cout, 1).astype(jnp.float32)

    # Left/right image-edge masks for the dx=0 / dx=2 taps (tiny constants).
    col = jnp.arange(m, dtype=jnp.int32) % w
    masks = jnp.stack([col != 0, col != w - 1], axis=0).astype(jnp.float32)

    # Several images per grid step (more work per step, less pipeline overhead).
    block_n = 1
    for cand in range(min(n, max_block_n), 0, -1):
        if n % cand == 0:
            block_n = cand
            break

    kernel = functools.partial(_conv3x3_bn_kernel, width=w, block_n=block_n,
                               apply_relu=relu, compute_dtype=compute_dtype)
    out_flat = pl.pallas_call(
        kernel,
        out_shape=jax.ShapeDtypeStruct((n, cout, m), jnp.float32),
        grid_spec=pltpu.PrefetchScalarGridSpec(
            num_scalar_prefetch=0,
            grid=(n // block_n,),
            in_specs=[
                pl.BlockSpec((block_n, cin, m), lambda i: (i, 0, 0)),
                pl.BlockSpec((cout, 9 * cin), lambda i: (0, 0)),   # constant -> DMA once
                pl.BlockSpec((cout, 1), lambda i: (0, 0)),
                pl.BlockSpec((2, m), lambda i: (0, 0)),
            ],
            out_specs=pl.BlockSpec((block_n, cout, m), lambda i: (i, 0, 0)),
        ),
        compiler_params=pltpu.CompilerParams(
            dimension_semantics=("parallel",),
        ),
    )(xflat, w_mat, bias2d, masks)

    return out_flat.reshape(n, cout, h, w)  # contiguous -> free


def fake_link_type1_forward(x_nchw, params):
    """Output of the module: bn2(conv2(x)). (conv1/bn1/relu branch is dead code.)"""
    return conv3x3_bn_nchw(x_nchw, params["w2"], params["s2"], params["b2"],
                           relu=False)


# ----------------------------------------------------------------------------
# Deterministic parameter init (mirrors module __init__)
# ----------------------------------------------------------------------------
def init_params(key, inplanes, outplanes, *, zero_init=True):
    # conv2 is Conv2d(outplanes, outplanes, 3); forward applies it to x, so the
    # module only typechecks when inplanes == outplanes.
    assert inplanes == outplanes, "Fake_link_type1 requires inplanes == outplanes"
    k1, k2 = jax.random.split(key)

    # conv1 / bn1 exist in the module but only feed the dead branch of forward().
    if zero_init:
        w1_oihw = jnp.zeros((outplanes, inplanes, 3, 3), jnp.float32)
    else:
        w1_oihw = jax.random.normal(k1, (outplanes, inplanes, 3, 3), jnp.float32) * 0.1
    w1_hwio = jnp.transpose(w1_oihw, (2, 3, 1, 0))

    w2_oihw = jax.random.normal(k2, (outplanes, outplanes, 3, 3), jnp.float32) * 0.1
    w2_hwio = jnp.transpose(w2_oihw, (2, 3, 1, 0))    # (3,3,Cin,Cout)

    # BatchNorm2d inference with PyTorch defaults: gamma=1, beta=0, mean=0, var=1.
    gamma = jnp.ones((outplanes,), jnp.float32)
    beta = jnp.zeros((outplanes,), jnp.float32)
    mean = jnp.zeros((outplanes,), jnp.float32)
    var = jnp.ones((outplanes,), jnp.float32)
    s2 = gamma / jnp.sqrt(var + EPS)
    b2 = beta - mean * s2
    s1 = gamma / jnp.sqrt(var + EPS)
    b1 = beta - mean * s1
    return dict(w1=w1_hwio, s1=s1, b1=b1, w2=w2_hwio, s2=s2, b2=b2)


# ----------------------------------------------------------------------------
# Pure-JAX reference
# ----------------------------------------------------------------------------
def reference_forward(x_nchw, params, *, compute_dtype=None):
    x = jnp.transpose(x_nchw, (0, 2, 3, 1))
    w = params["w2"] * params["s2"][None, None, None, :]
    if compute_dtype is not None:    # mimic the kernel's bf16 rounding exactly
        x = x.astype(compute_dtype).astype(jnp.float32)
        w = w.astype(compute_dtype).astype(jnp.float32)
    y = jax.lax.conv_general_dilated(
        x, w, window_strides=(1, 1), padding=[(1, 1), (1, 1)],
        dimension_numbers=("NHWC", "HWIO", "NHWC"),
        precision=jax.lax.Precision.HIGHEST)
    y = y + params["b2"][None, None, None, :]
    return jnp.transpose(y, (0, 3, 1, 2))


# ----------------------------------------------------------------------------
if __name__ == "__main__":
    key = jax.random.PRNGKey(0)
    kx, kp = jax.random.split(key)

    N, C, H, W = 2, 8, 16, 16          # inplanes == outplanes == 8
    x_nchw = jax.random.normal(kx, (N, C, H, W), jnp.float32)

    fwd = jax.jit(fake_link_type1_forward)

    for zero_init in (True, False):    # zero_init only touches the dead conv1 branch
        params = init_params(kp, C, C, zero_init=zero_init)
        out = jax.block_until_ready(fwd(x_nchw, params))
        assert out.shape == (N, C, H, W), out.shape

        # Tight check: reference fed the same bf16-rounded inputs (only
        # f32-accumulation-order differences remain).
        ref_bf16 = reference_forward(x_nchw, params, compute_dtype=jnp.bfloat16)
        assert jnp.allclose(out, ref_bf16, atol=1e-4, rtol=1e-4), float(
            jnp.max(jnp.abs(out - ref_bf16)))

        # Sanity check against the full-f32 module math (bf16 MXU tolerance).
        ref_f32 = reference_forward(x_nchw, params)
        assert jnp.allclose(out, ref_f32, atol=5e-2, rtol=5e-2), float(
            jnp.max(jnp.abs(out - ref_f32)))

    print("KERNEL_OK")
</pallas_src>

<mosaic_0001>
module attributes {stable_mosaic.version = 11 : i64} {
  func.func @_conv3x3_bn_kernel(%arg0: i32, %arg1: memref<2x8x256xf32, #tpu.memory_space<vmem>>, %arg2: memref<8x72xbf16, #tpu.memory_space<vmem>>, %arg3: memref<8x1xf32, #tpu.memory_space<vmem>>, %arg4: memref<2x256xf32, #tpu.memory_space<vmem>>, %arg5: memref<2x8x256xf32, #tpu.memory_space<vmem>>) attributes {dimension_semantics = [#tpu.dimension_semantics<parallel>], iteration_bounds = array<i64: 1>, scalar_prefetch = 0 : i64, scratch_operands = 0 : i64, tpu.core_type = #tpu.core_type<tc>, window_params = [{transform_indices = @transform_0, window_bounds = array<i64: 2, 8, 256>}, {pipeline_mode = #tpu.pipeline_mode<synchronous>, transform_indices = @transform_1, window_bounds = array<i64: 8, 72>}, {pipeline_mode = #tpu.pipeline_mode<synchronous>, transform_indices = @transform_2, window_bounds = array<i64: 8, 1>}, {pipeline_mode = #tpu.pipeline_mode<synchronous>, transform_indices = @transform_3, window_bounds = array<i64: 2, 256>}, {transform_indices = @transform_4, window_bounds = array<i64: 2, 8, 256>}]} {
    %c0 = arith.constant 0 : index
    %c0_0 = arith.constant 0 : index
    %0 = vector.load %arg4[%c0, %c0_0] : memref<2x256xf32, #tpu.memory_space<vmem>>, vector<2x256xf32>
    %1 = vector.extract_strided_slice %0 {offsets = [0, 0], sizes = [1, 256], strides = [1, 1]} : vector<2x256xf32> to vector<1x256xf32>
    %2 = vector.extract_strided_slice %0 {offsets = [1, 0], sizes = [1, 256], strides = [1, 1]} : vector<2x256xf32> to vector<1x256xf32>
    %c0_1 = arith.constant 0 : index
    %c0_2 = arith.constant 0 : index
    %3 = vector.load %arg2[%c0_1, %c0_2] : memref<8x72xbf16, #tpu.memory_space<vmem>>, vector<8x72xbf16>
    %c0_3 = arith.constant 0 : index
    %c0_4 = arith.constant 0 : index
    %4 = vector.load %arg3[%c0_3, %c0_4] : memref<8x1xf32, #tpu.memory_space<vmem>>, vector<8x1xf32>
    %cst = arith.constant 0.000000e+00 : f32
    %5 = vector.broadcast %cst : f32 to vector<8x128xf32>
    %c0_5 = arith.constant 0 : index
    %c0_6 = arith.constant 0 : index
    %c0_7 = arith.constant 0 : index
    %6 = vector.load %arg1[%c0_5, %c0_6, %c0_7] : memref<2x8x256xf32, #tpu.memory_space<vmem>>, vector<1x8x256xf32>
    %7 = vector.shape_cast %6 : vector<1x8x256xf32> to vector<8x256xf32>
    %8 = tpu.concatenate %5, %7, %5 in 1 : vector<8x128xf32>, vector<8x256xf32>, vector<8x128xf32> -> vector<8x512xf32>
    %9 = vector.extract_strided_slice %8 {offsets = [0, 111], sizes = [8, 256], strides = [1, 1]} : vector<8x512xf32> to vector<8x256xf32>
    %10 = vector.broadcast %1 : vector<1x256xf32> to vector<8x256xf32>
    %11 = arith.mulf %9, %10 : vector<8x256xf32>
    %12 = vector.extract_strided_slice %8 {offsets = [0, 112], sizes = [8, 256], strides = [1, 1]} : vector<8x512xf32> to vector<8x256xf32>
    %13 = vector.extract_strided_slice %8 {offsets = [0, 113], sizes = [8, 256], strides = [1, 1]} : vector<8x512xf32> to vector<8x256xf32>
    %14 = vector.broadcast %2 : vector<1x256xf32> to vector<8x256xf32>
    %15 = arith.mulf %13, %14 : vector<8x256xf32>
    %16 = vector.extract_strided_slice %8 {offsets = [0, 127], sizes = [8, 256], strides = [1, 1]} : vector<8x512xf32> to vector<8x256xf32>
    %17 = vector.broadcast %1 : vector<1x256xf32> to vector<8x256xf32>
    %18 = arith.mulf %16, %17 : vector<8x256xf32>
    %19 = vector.extract_strided_slice %8 {offsets = [0, 128], sizes = [8, 256], strides = [1, 1]} : vector<8x512xf32> to vector<8x256xf32>
    %20 = vector.extract_strided_slice %8 {offsets = [0, 129], sizes = [8, 256], strides = [1, 1]} : vector<8x512xf32> to vector<8x256xf32>
    %21 = vector.broadcast %2 : vector<1x256xf32> to vector<8x256xf32>
    %22 = arith.mulf %20, %21 : vector<8x256xf32>
    %23 = vector.extract_strided_slice %8 {offsets = [0, 143], sizes = [8, 256], strides = [1, 1]} : vector<8x512xf32> to vector<8x256xf32>
    %24 = vector.broadcast %1 : vector<1x256xf32> to vector<8x256xf32>
    %25 = arith.mulf %23, %24 : vector<8x256xf32>
    %26 = vector.extract_strided_slice %8 {offsets = [0, 144], sizes = [8, 256], strides = [1, 1]} : vector<8x512xf32> to vector<8x256xf32>
    %27 = vector.extract_strided_slice %8 {offsets = [0, 145], sizes = [8, 256], strides = [1, 1]} : vector<8x512xf32> to vector<8x256xf32>
    %28 = vector.broadcast %2 : vector<1x256xf32> to vector<8x256xf32>
    %29 = arith.mulf %27, %28 : vector<8x256xf32>
    %30 = tpu.concatenate %11, %12, %15, %18, %19, %22, %25, %26, %29 in 0 : vector<8x256xf32>, vector<8x256xf32>, vector<8x256xf32>, vector<8x256xf32>, vector<8x256xf32>, vector<8x256xf32>, vector<8x256xf32>, vector<8x256xf32>, vector<8x256xf32> -> vector<72x256xf32>
    %31 = arith.truncf %30 : vector<72x256xf32> to vector<72x256xbf16>
    %cst_8 = arith.constant dense<0.000000e+00> : vector<8x256xf32>
    %32 = tpu.matmul %3, %31, %cst_8 {dimension_numbers = #tpu.dot_dimension_numbers<[1], [0], [0], [1], [0, 0, 1, 1], [], []>} : vector<8x72xbf16>, vector<72x256xbf16>, vector<8x256xf32> -> vector<8x256xf32>
    %33 = vector.broadcast %4 : vector<8x1xf32> to vector<8x256xf32>
    %34 = arith.addf %32, %33 : vector<8x256xf32>
    %c0_9 = arith.constant 0 : index
    %c0_10 = arith.constant 0 : index
    %c0_11 = arith.constant 0 : index
    %35 = vector.load %arg5[%c0_9, %c0_10, %c0_11] : memref<2x8x256xf32, #tpu.memory_space<vmem>>, vector<1x8x256xf32>
    %36 = vector.shape_cast %35 : vector<1x8x256xf32> to vector<8x256xf32>
    %37 = vector.shape_cast %34 : vector<8x256xf32> to vector<1x8x256xf32>
    tpu.vector_store %arg5[%c0_9, %c0_10, %c0_11], %37 {strides = array<i32>} : memref<2x8x256xf32, #tpu.memory_space<vmem>>, vector<1x8x256xf32>,
    %c1 = arith.constant 1 : index
    %c0_12 = arith.constant 0 : index
    %c0_13 = arith.constant 0 : index
    %38 = vector.load %arg1[%c1, %c0_12, %c0_13] : memref<2x8x256xf32, #tpu.memory_space<vmem>>, vector<1x8x256xf32>
    %39 = vector.shape_cast %38 : vector<1x8x256xf32> to vector<8x256xf32>
    %40 = tpu.concatenate %5, %39, %5 in 1 : vector<8x128xf32>, vector<8x256xf32>, vector<8x128xf32> -> vector<8x512xf32>
    %41 = vector.extract_strided_slice %40 {offsets = [0, 111], sizes = [8, 256], strides = [1, 1]} : vector<8x512xf32> to vector<8x256xf32>
    %42 = vector.broadcast %1 : vector<1x256xf32> to vector<8x256xf32>
    %43 = arith.mulf %41, %42 : vector<8x256xf32>
    %44 = vector.extract_strided_slice %40 {offsets = [0, 112], sizes = [8, 256], strides = [1, 1]} : vector<8x512xf32> to vector<8x256xf32>
    %45 = vector.extract_strided_slice %40 {offsets = [0, 113], sizes = [8, 256], strides = [1, 1]} : vector<8x512xf32> to vector<8x256xf32>
    %46 = vector.broadcast %2 : vector<1x256xf32> to vector<8x256xf32>
    %47 = arith.mulf %45, %46 : vector<8x256xf32>
    %48 = vector.extract_strided_slice %40 {offsets = [0, 127], sizes = [8, 256], strides = [1, 1]} : vector<8x512xf32> to vector<8x256xf32>
    %49 = vector.broadcast %1 : vector<1x256xf32> to vector<8x256xf32>
    %50 = arith.mulf %48, %49 : vector<8x256xf32>
    %51 = vector.extract_strided_slice %40 {offsets = [0, 128], sizes = [8, 256], strides = [1, 1]} : vector<8x512xf32> to vector<8x256xf32>
    %52 = vector.extract_strided_slice %40 {offsets = [0, 129], sizes = [8, 256], strides = [1, 1]} : vector<8x512xf32> to vector<8x256xf32>
    %53 = vector.broadcast %2 : vector<1x256xf32> to vector<8x256xf32>
    %54 = arith.mulf %52, %53 : vector<8x256xf32>
    %55 = vector.extract_strided_slice %40 {offsets = [0, 143], sizes = [8, 256], strides = [1, 1]} : vector<8x512xf32> to vector<8x256xf32>
    %56 = vector.broadcast %1 : vector<1x256xf32> to vector<8x256xf32>
    %57 = arith.mulf %55, %56 : vector<8x256xf32>
    %58 = vector.extract_strided_slice %40 {offsets = [0, 144], sizes = [8, 256], strides = [1, 1]} : vector<8x512xf32> to vector<8x256xf32>
    %59 = vector.extract_strided_slice %40 {offsets = [0, 145], sizes = [8, 256], strides = [1, 1]} : vector<8x512xf32> to vector<8x256xf32>
    %60 = vector.broadcast %2 : vector<1x256xf32> to vector<8x256xf32>
    %61 = arith.mulf %59, %60 : vector<8x256xf32>
    %62 = tpu.concatenate %43, %44, %47, %50, %51, %54, %57, %58, %61 in 0 : vector<8x256xf32>, vector<8x256xf32>, vector<8x256xf32>, vector<8x256xf32>, vector<8x256xf32>, vector<8x256xf32>, vector<8x256xf32>, vector<8x256xf32>, vector<8x256xf32> -> vector<72x256xf32>
    %63 = arith.truncf %62 : vector<72x256xf32> to vector<72x256xbf16>
    %cst_14 = arith.constant dense<0.000000e+00> : vector<8x256xf32>
    %64 = tpu.matmul %3, %63, %cst_14 {dimension_numbers = #tpu.dot_dimension_numbers<[1], [0], [0], [1], [0, 0, 1, 1], [], []>} : vector<8x72xbf16>, vector<72x256xbf16>, vector<8x256xf32> -> vector<8x256xf32>
    %65 = vector.broadcast %4 : vector<8x1xf32> to vector<8x256xf32>
    %66 = arith.addf %64, %65 : vector<8x256xf32>
    %c1_15 = arith.constant 1 : index
    %c0_16 = arith.constant 0 : index
    %c0_17 = arith.constant 0 : index
    %67 = vector.load %arg5[%c1_15, %c0_16, %c0_17] : memref<2x8x256xf32, #tpu.memory_space<vmem>>, vector<1x8x256xf32>
    %68 = vector.shape_cast %67 : vector<1x8x256xf32> to vector<8x256xf32>
    %69 = vector.shape_cast %66 : vector<8x256xf32> to vector<1x8x256xf32>
    tpu.vector_store %arg5[%c1_15, %c0_16, %c0_17], %69 {strides = array<i32>} : memref<2x8x256xf32, #tpu.memory_space<vmem>>, vector<1x8x256xf32>,
    return
  }
  func.func @transform_0(%arg0: i32) -> (i32, i32, i32) {
    %c0_i32 = arith.constant 0 : i32
    %c0_i32_0 = arith.constant 0 : i32
    %c0_i32_1 = arith.constant 0 : i32
    return %arg0, %c0_i32, %c0_i32_0 : i32, i32, i32
  }
  func.func @transform_1(%arg0: i32) -> (i32, i32) {
    %c0_i32 = arith.constant 0 : i32
    %c0_i32_0 = arith.constant 0 : i32
    %c0_i32_1 = arith.constant 0 : i32
    return %c0_i32, %c0_i32_0 : i32, i32
  }
  func.func @transform_2(%arg0: i32) -> (i32, i32) {
    %c0_i32 = arith.constant 0 : i32
    %c0_i32_0 = arith.constant 0 : i32
    %c0_i32_1 = arith.constant 0 : i32
    return %c0_i32, %c0_i32_0 : i32, i32
  }
  func.func @transform_3(%arg0: i32) -> (i32, i32) {
    %c0_i32 = arith.constant 0 : i32
    %c0_i32_0 = arith.constant 0 : i32
    %c0_i32_1 = arith.constant 0 : i32
    return %c0_i32, %c0_i32_0 : i32, i32
  }
  func.func @transform_4(%arg0: i32) -> (i32, i32, i32) {
    %c0_i32 = arith.constant 0 : i32
    %c0_i32_0 = arith.constant 0 : i32
    %c0_i32_1 = arith.constant 0 : i32
    return %arg0, %c0_i32, %c0_i32_0 : i32, i32, i32
  }
}

</mosaic_0001>

<bundles_post_ra>
// kernel: fake_link_type1_forward.1
= control target key start
LH: loop header
LB: loop body
LE: loop exit
PB: predicated region body
PF: predicated region fallthrough
CT: control target
= control target key end

     0   :  { %s663_s17 = smov 17   ;;  %s664_s18 = smov 15   ;;  %v668_v10 = vmov 0.0   ;;  %vm104_vm0 = vcmask 138240   ;;  %vm80_vm1 = vcmask 7168   ;;  %vm92_vm2 = vcmask 121856   ;;  %s1006_s3 = inlined_call_operand.vmem [shape: f32[2,256], index: 3, kind: input, shape index: {}]   ;;  %s1007_s0 = inlined_call_operand.vmem [shape: f32[2,8,256], index: 0, kind: input, shape index: {}]   ;;  %s1008_s1 = inlined_call_operand.vmem [shape: bf16[8,72], index: 1, kind: input, shape index: {}]   ;;  %s1009_s2 = inlined_call_operand.vmem [shape: f32[8,1], index: 2, kind: input, shape index: {}]   ;;  %s1010_s4 = inlined_call_operand.vmem [shape: f32[2,8,256], index: 4, kind: output, shape index: {}]  }
   0x1   :  { %v18_v0 = vld [vmem:[%s1006_s3] sm:$0xf]  ;;  %s665_s19 = smov 1   ;;  %s666_s3 = smov 113   ;;  %v710_v9 = vld [vmem:[%s1007_s0 + $0x10] sm:$0xff]  ;;  %v721_v13 = vld [vmem:[%s1007_s0 + $0x18] sm:$0xff] }
   0x2   :  { %v44_v1 = vperm.slane %v18_v0, 1  ;;  %v24_v2 = vperm.slane %v18_v0, 0  ;;  %v45_v5 = vperm.slane %v18_v0, 3  ;;  %v25_v6 = vperm.slane %v18_v0, 2  ;;  %s667_s20 = smov 127   ;;  %s669_s23 = smov 95  }
   0x3   :  { %v581_v11 = vpack.i.bf16 %v710_v9, %v668_v10  ;;  %v716_v12 = vld [vmem:[%s1007_s0] sm:$0xff]  ;;  %s670_s28 = smov 111   ;;  %v726_v14 = vld [vmem:[%s1007_s0 + $0x8] sm:$0xff]  ;;  %v591_v17 = vpack.i.bf16 %v721_v13, %v710_v9  ;;  %s671_s0 = smov 110   ;;  %vm56_vm3 = vcmask 924672   ;;  %vm68_vm4 = vcmask 1039360  }
   0x4   :  { %v48_v3 = vperm.slane %v44_v1, 1  ;;  %v28_v4 = vperm.slane %v24_v2, 0  ;;  %v49_v7 = vperm.slane %v45_v5, 1  ;;  %v29_v8 = vperm.slane %v25_v6, 0  ;;  %s672_s5 = smov 94   ;;  %s673_s6 = smov 96  }
   0x5   :  { %v586_v15 = vpack.i.bf16 %v716_v12, %v721_v13  ;;  %v596_v16 = vpack.i.bf16 %v726_v14, %v716_v12  ;;  %s674_s7 = smov 126   ;;  %s675_s8 = smov 112   ;;  %vm200_vm5 = vcmask 777216   ;;  %vm36_vm6 = vcmask 908288  }
   0x6   :  { %100 = vrot.lane.b32.xlu0 %v48_v3, %s663_s17  ;;  %88 = vrot.lane.b32.xlu1 %v28_v4, %s664_s18  ;;  %vm215_vm7 = vcmask 769024   ;;  %vm188_vm8 = vcmask 785408   ;;  %vm173_vm9 = vcmask 900096   ;;  %vm150_vm10 = vcmask 916480  }
   0x7   :  { %76 = vrot.lane.b32.xlu2 %v48_v3, %s665_s19  ;;  %vm135_vm11 = vcmask 1031168   ;;  %vm309_vm12 = vcmask 1043456   ;;  %vm305_vm13 = vcmask 588800  }
   0xe   :  { %102 = vrot.lane.b32.xlu0 %v49_v7, %s663_s17  ;;  %90 = vrot.lane.b32.xlu1 %v29_v8, %s664_s18 }
   0xf   :  { %78 = vrot.lane.b32.xlu2 %v49_v7, %s665_s19 }
  0x16   :  { %52 = vrot.lane.b32.xlu0 %v48_v3, %s666_s3  ;;  %54 = vrot.lane.b32.xlu1 %v49_v7, %s666_s3 }
  0x17   :  { %64 = vrot.lane.b32.xlu2 %v28_v4, %s667_s20 }
  0x1e   :  { %66 = vrot.lane.b32.xlu0 %v29_v8, %s667_s20  ;;  %582 = vrot.lane.b32.xlu1 %v581_v11, %s669_s23 }
  0x1f   :  { %32 = vrot.lane.b32.xlu2 %v28_v4, %s670_s28 }
  0x26   :  { %587 = vrot.lane.b32.xlu0 %v586_v15, %s669_s23  ;;  %597 = vrot.lane.b32.xlu1 %v596_v16, %s670_s28 }
  0x2e   :  { %592 = vrot.lane.b32.xlu0 %v591_v17, %s670_s28  ;;  %607 = vrot.lane.b32.xlu1 %v586_v15, %s667_s20 }
  0x36   :  { %196 = vrot.lane.b32.xlu0 %v726_v14, %s669_s23  ;;  %119 = vrot.lane.b32.xlu1 %v726_v14, %s667_s20 }
  0x3e   :  { %34 = vrot.lane.b32.xlu0 %v29_v8, %s670_s28 }
  0x46   :  { %602 = vrot.lane.b32.xlu0 %v581_v11, %s667_s20 }
  0x61   :  { %v77_v18 = vpop.permute.xlu2 %76 }
  0x62   :  { %v353_v19 = vmul.f32 %v710_v9, %v77_v18  ;;  %v85_v40 = vmul.f32 %v77_v18, %v716_v12 }
  0x69   :  { %v79_v20 = vpop.permute.xlu2 %78 }
  0x6a   :  { %v87_v21 = vmul.f32 0.0, %v79_v20  ;;  %v81_v38 = vsel %vm80_vm1, %v77_v18, %v79_v20 }
  0x6b   :  { %v354_v42 = vmul.f32 %v721_v13, %v81_v38  ;;  %v86_v18 = vmul.f32 %v81_v38, %v726_v14 }
  0x6c   :  { %v621_v22 = vpack.i.bf16 %v353_v19, %v87_v21 }
  0x6d   :  { %v636_v48 = vpack.i.bf16 %v85_v40, %v354_v42 }
  0x6e   :  { %622 = vrot.lane.b32.xlu2 %v621_v22, %s671_s0 }
  0x71   :  { %v65_v56 = vpop.permute.xlu2 %64 }
  0x72   :  { %v73_v3 = vmul.f32 0.0, %v65_v56 }
  0x78   :  { %v101_v23 = vpop.permute.xlu0 %100  ;;  %v89_v24 = vpop.permute.xlu1 %88 }
  0x79   :  { %v355_v25 = vmul.f32 %v710_v9, %v89_v24  ;;  %v357_v28 = vmul.f32 %v710_v9, %v101_v23  ;;  %v109_v41 = vmul.f32 %v101_v23, %v716_v12  ;;  %v97_v49 = vmul.f32 %v89_v24, %v716_v12 }
  0x80   :  { %v103_v26 = vpop.permute.xlu0 %102  ;;  %v91_v27 = vpop.permute.xlu1 %90 }
  0x81   :  { %v111_v29 = vmul.f32 0.0, %v103_v26  ;;  %v99_v30 = vmul.f32 0.0, %v91_v27  ;;  %v105_v33 = vsel %vm104_vm0, %v101_v23, %v103_v26  ;;  %v93_v46 = vsel %vm92_vm2, %v89_v24, %v91_v27 }
  0x82   :  { %v110_v37 = vmul.f32 %v105_v33, %v726_v14  ;;  %v358_v39 = vmul.f32 %v721_v13, %v105_v33  ;;  %v356_v50 = vmul.f32 %v721_v13, %v93_v46  ;;  %v98_v1 = vmul.f32 %v93_v46, %v726_v14 }
  0x83   :  { %v611_v31 = vpack.i.bf16 %v357_v28, %v111_v29  ;;  %v616_v32 = vpack.i.bf16 %v355_v25, %v99_v30 }
  0x84   :  { %v626_v45 = vpack.i.bf16 %v109_v41, %v358_v39  ;;  %v631_v57 = vpack.i.bf16 %v97_v49, %v356_v50 }
  0x85   :  { %612 = vrot.lane.b32.xlu1 %v611_v31, %s672_s5  ;;  %617 = vrot.lane.b32.xlu0 %v616_v32, %s673_s6 }
  0x88   :  { %v53_v34 = vpop.permute.xlu0 %52  ;;  %v55_v35 = vpop.permute.xlu1 %54 }
  0x89   :  { %v63_v36 = vmul.f32 %v55_v35, %v726_v14  ;;  %v57_v47 = vsel %vm56_vm3, %v53_v34, %v55_v35  ;;  %v350_v52 = vmul.f32 %v721_v13, %v55_v35  ;;  %v61_v53 = vmul.f32 0.0, %v53_v34 }
  0x8a   :  { %v62_v51 = vmul.f32 %v57_v47, %v716_v12  ;;  %v349_v54 = vmul.f32 %v710_v9, %v57_v47 }
  0x8b   :  { %133 = vrot.lane.b32.xlu2 %v63_v36, %s674_s7 }
  0x8c   :  { %v651_v58 = vpack.i.bf16 %v62_v51, %v350_v52  ;;  %v641_v59 = vpack.i.bf16 %v349_v54, %v61_v53 }
  0x8d   :  { %211 = vrot.lane.b32.xlu1 %v110_v37, %s672_s5 }
  0x90   :  { %v67_v43 = vpop.permute.xlu0 %66  ;;  %v762_v61 = vpop.permute.xlu1 %582 }
  0x91   :  { %v75_v44 = vmul.f32 %v67_v43, %v726_v14  ;;  %v69_v60 = vsel %vm68_vm4, %v65_v56, %v67_v43  ;;  %v352_v62 = vmul.f32 %v721_v13, %v67_v43  ;;  %v584_v6 = vunpack.i.l.bf16 %v762_v61 }
  0x92   :  { %v74_v63 = vmul.f32 %v69_v60, %v716_v12  ;;  %v351_v4 = vmul.f32 %v710_v9, %v69_v60  ;;  %v585_v23 = vunpack.i.h.bf16 %v762_v61 }
  0x93   :  { %148 = vrot.lane.b32.xlu0 %v75_v44, %s675_s8  ;;  %627 = vrot.lane.b32.xlu2 %v626_v45, %s672_s5 }
  0x94   :  { %v656_v2 = vpack.i.bf16 %v74_v63, %v352_v62  ;;  %v646_v10 = vpack.i.bf16 %v351_v4, %v73_v3 }
  0x95   :  { %637 = vrot.lane.b32.xlu1 %v636_v48, %s671_s0 }
  0x98   :  { %v757_v55 = vpop.permute.xlu0 %587  ;;  %v775_v7 = vpop.permute.xlu1 %597 }
  0x99   :  { %v590_v5 = vunpack.i.h.bf16 %v757_v55  ;;  %v589_v22 = vunpack.i.l.bf16 %v757_v55  ;;  %v600_v26 = vunpack.i.h.bf16 %v775_v7  ;;  %v599_v27 = vunpack.i.l.bf16 %v775_v7 }
  0x9b   :  { %632 = vrot.lane.b32.xlu2 %v631_v57, %s673_s6  ;;  %652 = vrot.lane.b32.xlu0 %v651_v58, %s674_s7  ;;  %v426_v24 = vsel %vm200_vm5, %v585_v23, %v589_v22  ;;  %v794_v25 = vsel %vm200_vm5, %v589_v22, %v584_v6  ;;  %v810_v32 = vsel %vm36_vm6, %v599_v27, %v600_v26 }
  0x9d   :  { %642 = vrot.lane.b32.xlu1 %v641_v59, %s674_s7 }
  0xa0   :  { %v767_v0 = vpop.permute.xlu0 %592  ;;  %v608_v17 = vpop.permute.xlu1 %607 }
  0xa1   :  { %v609_v20 = vunpack.i.l.bf16 %v608_v17  ;;  %v610_v30 = vunpack.i.h.bf16 %v608_v17  ;;  %v595_v37 = vunpack.i.h.bf16 %v767_v0  ;;  %v594_v38 = vunpack.i.l.bf16 %v767_v0 }
  0xa3   :  { %184 = vrot.lane.b32.xlu2 %v98_v1, %s673_s6  ;;  %v396_v43 = vsel %vm36_vm6, %v594_v38, %v595_v37 }
  0xa5   :  { %657 = vrot.lane.b32.xlu1 %v656_v2, %s675_s8 }
  0xa8   :  { %v197_v8 = vpop.permute.xlu0 %196  ;;  %v813_v35 = vpop.permute.xlu1 %119 }
  0xa9   :  { %v780_v11 = vsel %vm200_vm5, %v590_v5, %v197_v8  ;;  %v783_v15 = vsel %vm200_vm5, %v197_v8, %v584_v6 }
  0xab   :  { %647 = vrot.lane.b32.xlu2 %v646_v10, %s675_s8 }
  0xb0   :  { %v35_v16 = vpop.permute.xlu0 %34 }
  0xb1   :  { %v348_v19 = vmul.f32 %v721_v13, %v35_v16  ;;  %v33_v13 = vpop.permute.xlu2 %32  ;;  %v800_v29 = vmul.f32 %v35_v16, %v726_v14  ;;  %v817_v14 = vsel %vm68_vm4, %v610_v30, %v813_v35 }
  0xb2   :  { %v37_v28 = vsel %vm36_vm6, %v33_v13, %v35_v16 }
  0xb3   :  { %169 = vrot.lane.b32.xlu2 %v86_v18, %s671_s0  ;;  %v444_v21 = vpack.c.bf16 %v609_v20, %v348_v19  ;;  %v803_v31 = vmul.f32 %v37_v28, %v716_v12  ;;  %v347_v33 = vmul.f32 %v710_v9, %v37_v28  ;;  %v223_v12 = vpack.c.bf16 %v813_v35, %v800_v29 }
  0xb4   :  { %v825_v9 = vmul.f32 0.0, %v33_v13 }
  0xb5   :  { %476 = vrot.lane.b32.xlu1 %v444_v21, %s663_s17  ;;  %v222_v40 = vpack.c.bf16 %v817_v14, %v803_v31 }
  0xb8   :  { %v603_v34 = vpop.permute.xlu0 %602 }
  0xb9   :  { %v605_v36 = vunpack.i.h.bf16 %v603_v34  ;;  %v604_v39 = vunpack.i.l.bf16 %v603_v34 }
  0xbb   :  { %v366_v41 = vsel %vm68_vm4, %v605_v36, %v609_v20  ;;  %v831_v44 = vsel %vm68_vm4, %v604_v39, %v610_v30  ;;  %v365_v46 = vsel %vm68_vm4, %v604_v39, %v605_v36 }
  0xbc   :  { %v443_v42 = vpack.c.bf16 %v366_v41, %v347_v33  ;;  %v221_v45 = vpack.c.bf16 %v831_v44, %v825_v9  ;;  %v442_v47 = vpack.c.bf16 %v365_v46, %v825_v9 }
  0xbe   :  { %474 = vrot.lane.b32.xlu0 %v443_v42, %s663_s17  ;;  %472 = vrot.lane.b32.xlu2 %v442_v47, %s663_s17 }
  0xc8   :  { %v623_v48 = vpop.permute.xlu2 %622 }
  0xc9   :  { %v624_v17 = vunpack.i.l.bf16 %v623_v48  ;;  %v625_v28 = vunpack.i.h.bf16 %v623_v48 }
  0xcb   :  { %v448_v39 = vpack.c.bf16 %v625_v28, %v594_v38 }
  0xe5   :  { %v838_v49 = vpop.permute.xlu2 %133 }
  0xed   :  { %v840_v50 = vpop.permute.xlu2 %627 }
  0xee   :  { %v629_v53 = vunpack.i.l.bf16 %v840_v50  ;;  %v630_v10 = vunpack.i.h.bf16 %v840_v50 }
  0xf0   :  { %v233_v20 = vpack.c.bf16 %v630_v10, %v630_v10 }
  0xf5   :  { %v842_v51 = vpop.permute.xlu2 %632 }
  0xf6   :  { %v634_v63 = vunpack.i.l.bf16 %v842_v51  ;;  %v635_v42 = vunpack.i.h.bf16 %v842_v51 }
  0xf7   :  { %v844_v52 = vpop.permute.xlu1 %612  ;;  %v848_v56 = vpop.permute.xlu0 %617 }
  0xf8   :  { %v615_v54 = vunpack.i.h.bf16 %v844_v52  ;;  %v620_v60 = vunpack.i.h.bf16 %v848_v56  ;;  %v619_v61 = vunpack.i.l.bf16 %v848_v56 }
  0xfa   :  { %v454_v57 = vpack.c.bf16 %v615_v54, %v615_v54  ;;  %v437_v58 = vsel %vm215_vm7, %v615_v54, %v629_v53  ;;  %v417_v3 = vsel %vm188_vm8, %v620_v60, %v634_v63  ;;  %v451_v4 = vpack.c.bf16 %v585_v23, %v620_v60 }
  0xfb   :  { %v455_v59 = vpack.c.bf16 %v437_v58, %v437_v58  ;;  %v452_v6 = vpack.c.bf16 %v426_v24, %v417_v3 }
  0xfc   :  { %496 = vrot.lane.b32.xlu2 %v454_v57, %s663_s17 }
  0xfd   :  { %v185_v62 = vpop.permute.xlu2 %184  ;;  %498 = vrot.lane.b32.xlu0 %v455_v59, %s663_s17 }
  0xfe   :  { %v861_v0 = vsel %vm188_vm8, %v185_v62, %v619_v61  ;;  %v189_v47 = vsel %vm188_vm8, %v635_v42, %v185_v62  ;;  %v614_v62 = vunpack.i.l.bf16 %v844_v52 }
  0xff   :  { %v232_v1 = vpack.c.bf16 %v783_v15, %v861_v0  ;;  %v865_v2 = vpop.permute.xlu1 %211  ;;  %v231_v58 = vpack.c.bf16 %v780_v11, %v189_v47 }
 0x100   :  { %v216_v18 = vsel %vm215_vm7, %v630_v10, %v865_v2  ;;  %v438_v7 = vsel %vm215_vm7, %v629_v53, %v614_v62  ;;  %v418_v53 = vsel %vm188_vm8, %v634_v63, %v619_v61  ;;  %v217_v51 = vsel %vm215_vm7, %v865_v2, %v614_v62 }
 0x101   :  { %v234_v22 = vpack.c.bf16 %v216_v18, %v216_v18  ;;  %v235_v56 = vpack.c.bf16 %v217_v51, %v217_v51 }
 0x104   :  { %490 = vrot.lane.b32.xlu2 %v451_v4, %s663_s17 }
 0x105   :  { %v871_v8 = vpop.permute.xlu2 %647  ;;  %492 = vrot.lane.b32.xlu0 %v452_v6, %s663_s17  ;;  %v149_v23 = vpop.permute.xlu0 %148 }
 0x106   :  { %v650_v38 = vunpack.i.h.bf16 %v871_v8  ;;  %v226_v55 = vpack.c.bf16 %v149_v23, %v838_v49  ;;  %v649_v6 = vunpack.i.l.bf16 %v871_v8 }
 0x107   :  { %v638_v16 = vpop.permute.xlu1 %637 }
 0x108   :  { %v639_v19 = vunpack.i.l.bf16 %v638_v16  ;;  %v387_v52 = vsel %vm150_vm10, %v649_v6, %v650_v38 }
 0x10a   :  { %v407_v21 = vsel %vm173_vm9, %v639_v19, %v624_v17  ;;  %v406_v36 = vsel %vm173_vm9, %v625_v28, %v639_v19 }
 0x10b   :  { %v878_v24 = vpack.c.bf16 %v407_v21, %v595_v37  ;;  %v449_v41 = vpack.c.bf16 %v406_v36, %v396_v43  ;;  %v640_v43 = vunpack.i.h.bf16 %v638_v16 }
 0x10c   :  { %280 = vrot.lane.b32.xlu2 %v233_v20, %s663_s17 }
 0x10d   :  { %v170_v13 = vpop.permute.xlu2 %169  ;;  %282 = vrot.lane.b32.xlu0 %v234_v22, %s663_s17  ;;  %v653_v37 = vpop.permute.xlu0 %652  ;;  %v453_v22 = vpack.c.bf16 %v794_v25, %v418_v53 }
 0x10e   :  { %v175_v30 = vsel %vm173_vm9, %v170_v13, %v624_v17  ;;  %v654_v48 = vunpack.i.l.bf16 %v653_v37  ;;  %v456_v17 = vpack.c.bf16 %v438_v7, %v438_v7  ;;  %v655_v8 = vunpack.i.h.bf16 %v653_v37 }
 0x10f   :  { %v885_v33 = vpack.c.bf16 %v175_v30, %v600_v26  ;;  %v643_v34 = vpop.permute.xlu1 %642  ;;  %v230_v26 = vpack.c.bf16 %v590_v5, %v635_v42  ;;  %v227_v5 = vpack.c.bf16 %v640_v43, %v599_v27  ;;  %v174_v27 = vsel %vm173_vm9, %v640_v43, %v170_v13 }
 0x110   :  { %v645_v59 = vunpack.i.h.bf16 %v643_v34  ;;  %v644_v3 = vunpack.i.l.bf16 %v643_v34  ;;  %v228_v18 = vpack.c.bf16 %v174_v27, %v810_v32  ;;  %v137_v13 = vsel %vm135_vm11, %v655_v8, %v838_v49 }
 0x112   :  { %v377_v11 = vsel %vm135_vm11, %v645_v59, %v654_v48  ;;  %v376_v10 = vsel %vm135_vm11, %v644_v3, %v645_v59  ;;  %v136_v32 = vsel %vm135_vm11, %v644_v3, %v655_v8 }
 0x113   :  { %v445_v16 = vpack.c.bf16 %v387_v52, %v376_v10  ;;  %v676_v10 = vmov 0  }
 0x114   :  { %484 = vrot.lane.b32.xlu2 %v448_v39, %s663_s17  ;;  %662 = vset.pattern.permute.xlu0 %v676_v10 }
 0x115   :  { %486 = vrot.lane.b32.xlu0 %v449_v41, %s663_s17  ;;  %661 = vset.pattern.permute.xlu2 %v676_v10 }
 0x117   :  { %v658_v46 = vpop.permute.xlu1 %657 }
 0x118   :  { %v659_v54 = vunpack.i.l.bf16 %v658_v46  ;;  %v660_v19 = vunpack.i.h.bf16 %v658_v46  ;;  %v473_v25 = vpop.permute.xlu2 %472 }
 0x11a   :  { %v447_v57 = vpack.c.bf16 %v659_v54, %v654_v48  ;;  %v388_v60 = vsel %vm150_vm10, %v650_v38, %v659_v54  ;;  %v151_v50 = vsel %vm150_vm10, %v649_v6, %v660_v19  ;;  %v152_v20 = vsel %vm150_vm10, %v660_v19, %v149_v23  ;;  %v20_v6 = vld [vmem:[%s1009_s2] sm:$0xff] }
 0x11b   :  { %v446_v4 = vpack.c.bf16 %v388_v60, %v377_v11  ;;  %v224_v21 = vpack.c.bf16 %v151_v50, %v136_v32  ;;  %v225_v28 = vpack.c.bf16 %v152_v20, %v137_v13 }
 0x11c   :  { %274 = vrot.lane.b32.xlu2 %v230_v26, %s663_s17  ;;  %482 = vrot.lane.b32.xlu1 %v447_v57, %s663_s17  ;;  %v19_v57 = vld [vmem:[%s1008_s1] sm:$0xf] }
 0x11d   :  { %276 = vrot.lane.b32.xlu0 %v231_v58, %s663_s17 }
 0x124   :  { %268 = vrot.lane.b32.xlu2 %v227_v5, %s663_s17  ;;  %266 = vrot.lane.b32.xlu1 %v226_v55, %s663_s17 }
 0x125   :  { %480 = vrot.lane.b32.xlu0 %v446_v4, %s663_s17 }
 0x12c   :  { %478 = vrot.lane.b32.xlu2 %v445_v16, %s663_s17  ;;  %500 = vrot.lane.b32.xlu1 %v456_v17, %s663_s17 }
 0x12d   :  { %270 = vrot.lane.b32.xlu0 %v228_v18, %s663_s17 }
 0x130   :  { %v956_v14 = vpop.permute.xlu0 %474 }
 0x131   :  { %v502_v42 = vsel %vm104_vm0, %v473_v25, %v956_v14 }
 0x134   :  { %262 = vrot.lane.b32.xlu2 %v224_v21, %s663_s17  ;;  %494 = vrot.lane.b32.xlu1 %v453_v22, %s663_s17 }
 0x135   :  { %264 = vrot.lane.b32.xlu0 %v225_v28, %s663_s17 }
 0x13c   :  { %256 = vrot.lane.b32.xlu2 %v221_v45, %s663_s17  ;;  %284 = vrot.lane.b32.xlu1 %v235_v56, %s663_s17 }
 0x13d   :  { %258 = vrot.lane.b32.xlu0 %v222_v40, %s663_s17 }
 0x144   :  { %488 = vrot.lane.b32.xlu1 %v878_v24, %s663_s17  ;;  %238 = vperm.xlu2 %661, %v20_v6  }
 0x14c   :  { %278 = vrot.lane.b32.xlu1 %v232_v1, %s663_s17  ;;  %v477_v1 = vpop.permute.xlu1 %476 }
 0x14d   :  { %v503_v18 = vsel %vm104_vm0, %v956_v14, %v477_v1 }
 0x154   :  { %272 = vrot.lane.b32.xlu1 %v885_v33, %s663_s17 }
 0x156   :  { %v497_v9 = vpop.permute.xlu2 %496 }
 0x15c   :  { %260 = vrot.lane.b32.xlu1 %v223_v12, %s663_s17 }
 0x15e   :  { %v491_v31 = vpop.permute.xlu2 %490 }
 0x166   :  { %v281_v40 = vpop.permute.xlu2 %280 }
 0x16e   :  { %v485_v63 = vpop.permute.xlu2 %484 }
 0x16f   :  { %v499_v44 = vpop.permute.xlu0 %498 }
 0x170   :  { %v510_v45 = vsel %vm104_vm0, %v497_v9, %v499_v44 }
 0x171   :  { %v521_v15 = vsel %vm309_vm12, %v510_v45, 0 }
 0x172   :  { %529 = vmatpush.bf16.msra.mxu2 %v521_v15 }
 0x176   :  { %v275_v12 = vpop.permute.xlu2 %274 }
 0x177   :  { %v493_v49 = vpop.permute.xlu0 %492 }
 0x178   :  { %v508_v61 = vsel %vm104_vm0, %v491_v31, %v493_v49 }
 0x179   :  { %530 = vmatpush.bf16.msra.mxu2 %v508_v61 }
 0x17e   :  { %v269_v24 = vpop.permute.xlu2 %268 }
 0x17f   :  { %v283_v0 = vpop.permute.xlu0 %282 }
 0x180   :  { %v295_v29 = vsel %vm104_vm0, %v281_v40, %v283_v0 }
 0x181   :  { %v311_v35 = vsel %vm309_vm12, %v295_v29, 0 }
 0x182   :  { %319 = vmatpush.bf16.msra.mxu0 %v311_v35 }
 0x186   :  { %v479_v39 = vpop.permute.xlu2 %478 }
 0x187   :  { %v487_v2 = vpop.permute.xlu0 %486 }
 0x188   :  { %v506_v23 = vsel %vm104_vm0, %v485_v63, %v487_v2 }
 0x189   :  { %531 = vmatpush.bf16.msra.mxu2 %v506_v23 }
 0x18e   :  { %v483_v30 = vpop.permute.xlu1 %482  ;;  %v263_v58 = vpop.permute.xlu2 %262 }
 0x18f   :  { %v277_v33 = vpop.permute.xlu0 %276 }
 0x190   :  { %v293_v34 = vsel %vm104_vm0, %v275_v12, %v277_v33 }
 0x191   :  { %320 = vmatpush.bf16.msra.mxu0 %v293_v34 }
 0x196   :  { %v267_v36 = vpop.permute.xlu1 %266  ;;  %v257_v5 = vpop.permute.xlu2 %256 }
 0x197   :  { %v481_v41 = vpop.permute.xlu0 %480 }
 0x198   :  { %v504_v37 = vsel %vm104_vm0, %v479_v39, %v481_v41  ;;  %v505_v52 = vsel %vm104_vm0, %v481_v41, %v483_v30 }
 0x199   :  { %532 = vmatpush.bf16.msra.mxu2 %v504_v37 }
 0x19d   :  { %533 = vmatpush.bf16.msra.mxu2 %v502_v42 }
 0x19e   :  { %v501_v46 = vpop.permute.xlu1 %500  ;;  %v239_v21 = vpop.permute.xlu2 %238 }
 0x19f   :  { %v271_v47 = vpop.permute.xlu0 %270  ;;  %v511_v48 = vsel %vm104_vm0, %v499_v44, %v501_v46 }
 0x1a0   :  { %v291_v54 = vsel %vm104_vm0, %v269_v24, %v271_v47  ;;  %v524_v26 = vsel %vm309_vm12, %v511_v48, 0  ;;  %563 = vmatmul.msk.bf16.vlgmr.msra.gmra.mxu2 %vm305_vm13, %v19_v57 }
 0x1a1   :  { %321 = vmatpush.bf16.msra.mxu0 %v291_v54  ;;  %542 = vmatpush.bf16.msra.mxu3 %v524_v26 }
 0x1a6   :  { %v495_v38 = vpop.permute.xlu1 %494 }
 0x1a7   :  { %v265_v43 = vpop.permute.xlu0 %264  ;;  %v509_v59 = vsel %vm104_vm0, %v493_v49, %v495_v38 }
 0x1a8   :  { %543 = vmatpush.bf16.msra.mxu3 %v509_v59  ;;  %v289_v60 = vsel %vm104_vm0, %v263_v58, %v265_v43  ;;  %v290_v50 = vsel %vm104_vm0, %v265_v43, %v267_v36 }
 0x1a9   :  { %322 = vmatpush.bf16.msra.mxu0 %v289_v60 }
 0x1ae   :  { %v285_v55 = vpop.permute.xlu1 %284 }
 0x1af   :  { %v259_v11 = vpop.permute.xlu0 %258  ;;  %v296_v62 = vsel %vm104_vm0, %v283_v0, %v285_v55 }
 0x1b0   :  { %v287_v3 = vsel %vm104_vm0, %v257_v5, %v259_v11  ;;  %v314_v4 = vsel %vm309_vm12, %v296_v62, 0 }
 0x1b1   :  { %323 = vmatpush.bf16.msra.mxu0 %v287_v3  ;;  %332 = vmatpush.bf16.msra.mxu1 %v314_v4 }
 0x1b4   :  { %559 = vmatmul.msk.bf16.vlgmr.msra.gmra.mxu0 %vm305_vm13, %v19_v57 }
 0x1b6   :  { %v489_v7 = vpop.permute.xlu1 %488 }
 0x1b7   :  { %v507_v27 = vsel %vm104_vm0, %v487_v2, %v489_v7 }
 0x1b8   :  { %544 = vmatpush.bf16.msra.mxu3 %v507_v27 }
 0x1bc   :  { %545 = vmatpush.bf16.msra.mxu3 %v505_v52 }
 0x1be   :  { %v279_v16 = vpop.permute.xlu1 %278 }
 0x1bf   :  { %v294_v17 = vsel %vm104_vm0, %v277_v33, %v279_v16 }
 0x1c0   :  { %333 = vmatpush.bf16.msra.mxu1 %v294_v17  ;;  %546 = vmatpush.bf16.msra.mxu3 %v503_v18 }
 0x1c3   :  { %564 = vmatmul.msk.bf16.vlgmr.msra.gmra.mxu3 %vm305_vm13, %v19_v57 }
 0x1c6   :  { %v273_v19 = vpop.permute.xlu1 %272 }
 0x1c7   :  { %v292_v8 = vsel %vm104_vm0, %v271_v47, %v273_v19 }
 0x1c8   :  { %334 = vmatpush.bf16.msra.mxu1 %v292_v8 }
 0x1cc   :  { %335 = vmatpush.bf16.msra.mxu1 %v290_v50 }
 0x1ce   :  { %v261_v53 = vpop.permute.xlu1 %260 }
 0x1cf   :  { %v288_v20 = vsel %vm104_vm0, %v259_v11, %v261_v53 }
 0x1d0   :  { %336 = vmatpush.bf16.msra.mxu1 %v288_v20 }
 0x1d3   :  { %560 = vmatmul.msk.bf16.vlgmr.msra.gmra.mxu1 %vm305_vm13, %v19_v57 }
 0x223   :  { %v535_v32 = vpop.f32.mrf.mxu2 }
 0x224   :  { %v536_v22 = vadd.f32 %v535_v32, %v239_v21 }
 0x226   :  { %565 = vst [vmem:[%s1010_s4 + $0x10] sm:$0xff] %v536_v22 }
 0x22b   :  { %v537_v13 = vpop.f32.mrf.mxu2 }
 0x231   :  { %v325_v28 = vpop.f32.mrf.mxu0 }
 0x232   :  { %v326_v51 = vadd.f32 %v325_v28, %v239_v21 }
 0x234   :  { %342 = vst [vmem:[%s1010_s4] sm:$0xff] %v326_v51 }
 0x239   :  { %v327_v56 = vpop.f32.mrf.mxu0 }
 0x246   :  { %v548_v25 = vpop.f32.mrf.mxu3 }
 0x247   :  { %v549_v9 = vadd.f32 %v548_v25, %v239_v21 }
 0x249   :  { %566 = vst [vmem:[%s1010_s4 + $0x18] sm:$0xff] %v549_v9 }
 0x24e   :  { %v550_v31 = vpop.f32.mrf.mxu3 }
 0x250   :  { %v338_v14 = vpop.f32.mrf.mxu1 }
 0x251   :  { %v339_v40 = vadd.f32 %v338_v14, %v239_v21 }
 0x253   :  { %343 = vst [vmem:[%s1010_s4 + $0x8] sm:$0xff] %v339_v40 }
 0x258   :  { %v340_v44 = vpop.f32.mrf.mxu1 }

</bundles_post_ra>
